<compile_context>
chip_gen: v6e
topology: v6e:2x2x1
jax: 0.10.0
libtpu: 0.0.40
codegen_flags: <defaults>
</compile_context>

<pallas_src>
import functools
import math

import jax
import jax.numpy as jnp
from jax import lax
from jax.experimental import pallas as pl
from jax.experimental.pallas import tpu as pltpu


# ---------------------------------------------------------------------------
# Helpers
# ---------------------------------------------------------------------------
def _round_up(n, m):
    return ((n + m - 1) // m) * m


def _pad_to(arr, target_shape):
    pads = [(0, t - s) for s, t in zip(arr.shape, target_shape)]
    if all(p == (0, 0) for p in pads):
        return arr
    return jnp.pad(arr, pads)


def _itemsize(dtype):
    return jnp.dtype(dtype).itemsize


def _sublane_multiple(dtype):
    # 8 rows per vreg for 4-byte dtypes, 16 for 2-byte, 32 for 1-byte.
    return max(8, 32 // _itemsize(dtype))


# ---------------------------------------------------------------------------
# Single-cell kernel: two MXU dots + bias + tanh (no activation concat)
# ---------------------------------------------------------------------------
def _rnn_cell_kernel(x_ref, h_ref, wi_ref, wh_ref, b_ref, out_ref, *,
                     mxu_dtype=None):
    x = x_ref[...]
    h = h_ref[...]
    if mxu_dtype is not None:
        h = h.astype(mxu_dtype)          # weights/x already pre-cast in wrapper
    pre = (jnp.dot(x, wi_ref[...], preferred_element_type=jnp.float32)
           + jnp.dot(h, wh_ref[...], preferred_element_type=jnp.float32)
           + b_ref[...].astype(jnp.float32))
    out_ref[...] = jnp.tanh(pre).astype(out_ref.dtype)


def rnn_cell_forward(x, h_t_1, w_i, w_h, b_h, *, mxu_dtype=None):
    """h_t = tanh(x @ w_i + h_{t-1} @ w_h + b_h), single step."""
    B, in_size = x.shape
    H = w_h.shape[0]
    assert h_t_1.shape == (B, H)
    assert w_i.shape == (in_size, H)
    assert b_h.shape == (1, H)

    orig_dtype = x.dtype
    act_dtype = mxu_dtype if mxu_dtype is not None else x.dtype
    Bp = _round_up(B, _sublane_multiple(act_dtype))
    Kip = _round_up(in_size, 128)
    Hp = _round_up(H, 128)

    # Pad once; pre-cast weights/x in the wrapper (not in-kernel).
    x_p = _pad_to(x, (Bp, Kip))
    h_p = _pad_to(h_t_1, (Bp, Hp))
    wi_p = _pad_to(w_i, (Kip, Hp))
    wh_p = _pad_to(w_h, (Hp, Hp))
    b_p = _pad_to(b_h, (1, Hp))
    if mxu_dtype is not None:
        x_p = x_p.astype(mxu_dtype)
        wi_p = wi_p.astype(mxu_dtype)
        wh_p = wh_p.astype(mxu_dtype)

    need = (x_p.size * _itemsize(x_p.dtype) + h_p.size * _itemsize(h_p.dtype)
            + wi_p.size * _itemsize(wi_p.dtype) + wh_p.size * _itemsize(wh_p.dtype)
            + b_p.size * _itemsize(b_p.dtype) + Bp * Hp * _itemsize(orig_dtype))
    vmem_limit = int(min(max(2 * need, 32 << 20), 100 << 20))

    vmem_spec = pl.BlockSpec(memory_space=pltpu.MemorySpace.VMEM)
    out = pl.pallas_call(
        functools.partial(_rnn_cell_kernel, mxu_dtype=mxu_dtype),
        out_shape=jax.ShapeDtypeStruct((Bp, Hp), orig_dtype),
        in_specs=[vmem_spec] * 5,
        out_specs=vmem_spec,
        compiler_params=pltpu.CompilerParams(vmem_limit_bytes=vmem_limit),
    )(x_p, h_p, wi_p, wh_p, b_p)
    return out[:B, :H]


# ---------------------------------------------------------------------------
# Recurrent kernel: steps_per_block timesteps per grid step, weights resident
# in VMEM (single copy, no pipeline buffers), h carried in f32 VMEM scratch.
# ---------------------------------------------------------------------------
def _rnn_seq_kernel(x_ref, h0_ref, wi_ref, wh_ref, b_ref, out_ref, h_scratch,
                    *, steps_per_block, mxu_dtype=None):
    @pl.when(pl.program_id(0) == 0)
    def _():
        h_scratch[...] = h0_ref[...].astype(jnp.float32)

    wi = wi_ref[...]                       # resident, already in mxu dtype
    wh = wh_ref[...]
    bias = b_ref[...].astype(jnp.float32)

    def step(s, carry):
        x_t = x_ref[s]                     # (Bp, Kip), pre-cast in wrapper
        h_prev = h_scratch[...]            # (Bp, Hp) f32 carry
        h_in = h_prev if mxu_dtype is None else h_prev.astype(mxu_dtype)
        pre = (jnp.dot(x_t, wi, preferred_element_type=jnp.float32)
               + jnp.dot(h_in, wh, preferred_element_type=jnp.float32)
               + bias)
        h_new = jnp.tanh(pre)
        h_scratch[...] = h_new
        out_ref[s] = h_new.astype(out_ref.dtype)
        return carry

    lax.fori_loop(0, steps_per_block, step, 0, unroll=True)


def rnn_forward_sequence(xs, h0, w_i, w_h, b_h, *, steps_per_block=8,
                         mxu_dtype=None):
    """Run the RNN cell over xs[t] for t = 0..T-1; returns all hidden states."""
    T, B, in_size = xs.shape
    H = w_h.shape[0]
    assert h0.shape == (B, H)
    assert w_i.shape == (in_size, H)
    assert b_h.shape == (1, H)

    orig_dtype = xs.dtype
    act_dtype = mxu_dtype if mxu_dtype is not None else xs.dtype
    Bp = _round_up(B, _sublane_multiple(act_dtype))
    Kip = _round_up(in_size, 128)
    Hp = _round_up(H, 128)

    Tb = max(1, min(steps_per_block, T))
    Tp = _round_up(T, Tb)                 # extra (zero-x) steps are sliced off

    xs_p = _pad_to(xs, (Tp, Bp, Kip))
    h0_p = _pad_to(h0, (Bp, Hp))
    wi_p = _pad_to(w_i, (Kip, Hp))
    wh_p = _pad_to(w_h, (Hp, Hp))
    b_p = _pad_to(b_h, (1, Hp))
    if mxu_dtype is not None:             # cast ONCE here, never per grid step
        xs_p = xs_p.astype(mxu_dtype)
        wi_p = wi_p.astype(mxu_dtype)
        wh_p = wh_p.astype(mxu_dtype)

    # VMEM budget: resident operands + double-buffered x/out blocks + scratch.
    resident = (wi_p.size * _itemsize(wi_p.dtype)
                + wh_p.size * _itemsize(wh_p.dtype)
                + b_p.size * _itemsize(b_p.dtype)
                + h0_p.size * _itemsize(h0_p.dtype))
    pipelined = (2 * Tb * Bp * Kip * _itemsize(xs_p.dtype)
                 + 2 * Tb * Bp * Hp * _itemsize(orig_dtype))
    scratch = Bp * Hp * 4
    need = resident + pipelined + scratch
    vmem_limit = int(min(max(2 * need, 32 << 20), 100 << 20))

    resident_spec = pl.BlockSpec(memory_space=pltpu.MemorySpace.VMEM)
    out = pl.pallas_call(
        functools.partial(_rnn_seq_kernel, steps_per_block=Tb,
                          mxu_dtype=mxu_dtype),
        out_shape=jax.ShapeDtypeStruct((Tp, Bp, Hp), orig_dtype),
        grid=(Tp // Tb,),
        in_specs=[
            pl.BlockSpec((Tb, Bp, Kip), lambda g: (g, 0, 0)),  # x: pipelined
            resident_spec,                                     # h0: resident
            resident_spec,                                     # w_i: resident
            resident_spec,                                     # w_h: resident
            resident_spec,                                     # b_h: resident
        ],
        out_specs=pl.BlockSpec((Tb, Bp, Hp), lambda g: (g, 0, 0)),
        scratch_shapes=[pltpu.VMEM((Bp, Hp), jnp.float32)],    # h carry
        compiler_params=pltpu.CompilerParams(
            dimension_semantics=("arbitrary",),                # true recurrence
            vmem_limit_bytes=vmem_limit,
        ),
    )(xs_p, h0_p, wi_p, wh_p, b_p)
    return out[:T, :B, :H]


# ---------------------------------------------------------------------------
# Parameter init matching RNN_Cell.init_weights
# ---------------------------------------------------------------------------
def init_rnn_cell_params(key, input_size, hidden_size, dtype=jnp.float32):
    s = 1.0 / math.sqrt(hidden_size)
    k_wh, k_wi, k_bh = jax.random.split(key, 3)
    w_h = jax.random.uniform(k_wh, (hidden_size, hidden_size), dtype, -s, s)
    w_i = jax.random.uniform(k_wi, (input_size, hidden_size), dtype, -s, s)
    b_h = jax.random.uniform(k_bh, (1, hidden_size), dtype, -s, s)
    return w_i, w_h, b_h


if __name__ == "__main__":
    key = jax.random.PRNGKey(0)
    k_params, k_x, k_h, k_xs = jax.random.split(key, 4)

    batch = 8
    input_size = 16
    hidden_size = 32
    seq_len = 16

    w_i, w_h, b_h = init_rnn_cell_params(k_params, input_size, hidden_size)
    x = jax.random.normal(k_x, (batch, input_size), jnp.float32)
    h_t_1 = jax.random.normal(k_h, (batch, hidden_size), jnp.float32)

    # --- single cell step (matches RNN_Cell.forward) ---
    out = jax.block_until_ready(rnn_cell_forward(x, h_t_1, w_i, w_h, b_h))
    ref = jnp.tanh(x @ w_i + h_t_1 @ w_h + b_h)
    assert out.shape == (batch, hidden_size)
    assert jnp.allclose(out, ref, atol=1e-4, rtol=1e-4), \
        float(jnp.max(jnp.abs(out - ref)))

    # --- recurrent use: weights resident in VMEM, h carried across steps ---
    xs = jax.random.normal(k_xs, (seq_len, batch, input_size), jnp.float32)
    hs = jax.block_until_ready(
        rnn_forward_sequence(xs, h_t_1, w_i, w_h, b_h, steps_per_block=4))

    def _step(h, x_t):
        h_new = jnp.tanh(x_t @ w_i + h @ w_h + b_h)
        return h_new, h_new

    _, hs_ref = jax.lax.scan(_step, h_t_1, xs)
    assert hs.shape == (seq_len, batch, hidden_size)
    assert jnp.allclose(hs, hs_ref, atol=1e-4, rtol=1e-4), \
        float(jnp.max(jnp.abs(hs - hs_ref)))

    print("KERNEL_OK")
</pallas_src>

<mosaic_0001>
module attributes {stable_mosaic.version = 11 : i64} {
  func.func @_rnn_cell_kernel(%arg0: memref<8x128xf32, #tpu.memory_space<vmem>>, %arg1: memref<8x128xf32, #tpu.memory_space<vmem>>, %arg2: memref<128x128xf32, #tpu.memory_space<vmem>>, %arg3: memref<128x128xf32, #tpu.memory_space<vmem>>, %arg4: memref<1x128xf32, #tpu.memory_space<vmem>>, %arg5: memref<8x128xf32, #tpu.memory_space<vmem>>) attributes {dimension_semantics = [], scalar_prefetch = 0 : i64, scratch_operands = 0 : i64, tpu.core_type = #tpu.core_type<tc>} {
    %c0 = arith.constant 0 : index
    %c0_0 = arith.constant 0 : index
    %0 = vector.load %arg0[%c0, %c0_0] : memref<8x128xf32, #tpu.memory_space<vmem>>, vector<8x128xf32>
    %c0_1 = arith.constant 0 : index
    %c0_2 = arith.constant 0 : index
    %1 = vector.load %arg1[%c0_1, %c0_2] : memref<8x128xf32, #tpu.memory_space<vmem>>, vector<8x128xf32>
    %c0_3 = arith.constant 0 : index
    %c0_4 = arith.constant 0 : index
    %2 = vector.load %arg2[%c0_3, %c0_4] : memref<128x128xf32, #tpu.memory_space<vmem>>, vector<128x128xf32>
    %cst = arith.constant dense<0.000000e+00> : vector<8x128xf32>
    %3 = tpu.matmul %0, %2, %cst {dimension_numbers = #tpu.dot_dimension_numbers<[1], [0], [0], [1], [0, 0, 1, 1], [], []>} : vector<8x128xf32>, vector<128x128xf32>, vector<8x128xf32> -> vector<8x128xf32>
    %c0_5 = arith.constant 0 : index
    %c0_6 = arith.constant 0 : index
    %4 = vector.load %arg3[%c0_5, %c0_6] : memref<128x128xf32, #tpu.memory_space<vmem>>, vector<128x128xf32>
    %cst_7 = arith.constant dense<0.000000e+00> : vector<8x128xf32>
    %5 = tpu.matmul %1, %4, %cst_7 {dimension_numbers = #tpu.dot_dimension_numbers<[1], [0], [0], [1], [0, 0, 1, 1], [], []>} : vector<8x128xf32>, vector<128x128xf32>, vector<8x128xf32> -> vector<8x128xf32>
    %6 = arith.addf %3, %5 : vector<8x128xf32>
    %c0_8 = arith.constant 0 : index
    %c0_9 = arith.constant 0 : index
    %7 = vector.load %arg4[%c0_8, %c0_9] : memref<1x128xf32, #tpu.memory_space<vmem>>, vector<1x128xf32>
    %8 = vector.broadcast %7 : vector<1x128xf32> to vector<8x128xf32>
    %9 = arith.addf %6, %8 : vector<8x128xf32>
    %10 = math.tanh %9 : vector<8x128xf32>
    %c0_10 = arith.constant 0 : index
    %c0_11 = arith.constant 0 : index
    %11 = vector.load %arg5[%c0_10, %c0_11] : memref<8x128xf32, #tpu.memory_space<vmem>>, vector<8x128xf32>
    tpu.vector_store %arg5[%c0_10, %c0_11], %10 {strides = array<i32>} : memref<8x128xf32, #tpu.memory_space<vmem>>, vector<8x128xf32>,
    return
  }
}

</mosaic_0001>

<bundles_post_ra>
// kernel: tpu_custom_call.1
= control target key start
LH: loop header
LB: loop body
LE: loop exit
PB: predicated region body
PF: predicated region fallthrough
CT: control target
= control target key end

     0   :  { %10 = vsyncpa [#allocation3], 0  ;;  %s588_s0 = inlined_call_operand.hbm [shape: f32[8,128], index: 0, kind: input, shape index: {}]   ;;  %s589_s1 = inlined_call_operand.hbm [shape: f32[8,128], index: 1, kind: input, shape index: {}]   ;;  %s590_s2 = inlined_call_operand.hbm [shape: f32[128,128], index: 2, kind: input, shape index: {}]   ;;  %s591_s3 = inlined_call_operand.hbm [shape: f32[128,128], index: 3, kind: input, shape index: {}]   ;;  %s592_s4 = inlined_call_operand.vmem [shape: f32[1,128], index: 4, kind: input, shape index: {}]   ;;  %s593_s5 = inlined_call_operand.hbm [shape: f32[8,128], index: 5, kind: output, shape index: {}]  }
   0x1   :  { %11 = vsyncpa [#allocation6], 0 }
   0x2   :  { %12 = vsyncpa [#allocation9], 0 }
   0x3   :  { %13 = vsyncpa [#allocation4], 0  ;;  %s497_s18 = smov [#allocation5]   ;;  %s498_s20 = smov [#allocation2]  }
   0x4   :  { %s30_s19 = sshll.u32 %s497_s18, 4  ;;  %s20_s21 = sshll.u32 %s498_s20, 4  ;;  %s31_s19 = int_to_ptr.vmem [resolvable:$true] %s30_s19  ;;  %s21_s21 = int_to_ptr.vmem [resolvable:$true] %s20_s21 }
   0x5   :  { %s397_s22 = scalar_lea.vmem %s31_s19, 128  ;;  %p402_p1 = scmp.lt.s32.totalorder %s31_s19, %s31_s19 }
   0x6   :  { %p398_p0 = scmp.ne.s32.totalorder %s31_s19, %s397_s22  ;;  %p403_p2 = scmp.lt.s32.totalorder %s397_s22, %s397_s22 }
   0x8   :  { %p404_p3 = por %p403_p2, %p402_p1 }
   0xa   :  { %p405_p4 = pnand %p404_p3, %p398_p0 }
   0xc   :  { %408 = shalt.err (!%p405_p4)
}
   0xd   :  { %33 = dma.hbm_to_vmem [thread:$0]  %s589_s1, 128, %s31_s19, [#allocation6]  }
   0xe   :  { %s417_s25 = scalar_lea.vmem %s21_s21, 128  ;;  %p422_p6 = scmp.lt.s32.totalorder %s21_s21, %s21_s21 }
   0xf   :  { %p418_p5 = scmp.ne.s32.totalorder %s21_s21, %s417_s25  ;;  %p423_p7 = scmp.lt.s32.totalorder %s417_s25, %s417_s25 }
  0x11   :  { %p424_p8 = por %p423_p7, %p422_p6 }
  0x13   :  { %p425_p9 = pnand %p424_p8, %p418_p5 }
  0x15   :  { %428 = shalt.err (!%p425_p9)
}
  0x16   :  { %23 = dma.hbm_to_vmem [thread:$0]  %s588_s0, 128, %s21_s21, [#allocation3]  }
  0x17   :  { %s499_s28 = smov [#allocation7]  }
  0x18   :  { %s39_s29 = sshll.u32 %s499_s28, 4  ;;  %s40_s29 = int_to_ptr.vmem [resolvable:$true] %s39_s29 }
  0x19   :  { %s437_s30 = scalar_lea.vmem %s40_s29, 2048  ;;  %p442_p11 = scmp.lt.s32.totalorder %s40_s29, %s40_s29 }
  0x1a   :  { %p438_p10 = scmp.ne.s32.totalorder %s40_s29, %s437_s30  ;;  %p443_p12 = scmp.lt.s32.totalorder %s437_s30, %s437_s30 }
  0x1c   :  { %p444_p13 = por %p443_p12, %p442_p11 }
  0x1e   :  { %p445_p0 = pnand %p444_p13, %p438_p10 }
  0x20   :  { %448 = shalt.err (!%p445_p0)
}
  0x21   :  { %s500_s1 = smov 128   ;;  %s501_s6 = smov 8  }
  0x22   :  { %45 = dma.hbm_to_vmem [thread:$0]  %s590_s2, 2048, %s40_s29, [#allocation6], %s500_s1, %s500_s1, %s501_s6  }
  0x23   :  { %s502_s9 = smov [#allocation8]  }
  0x24   :  { %s51_s10 = sshll.u32 %s502_s9, 4  ;;  %s52_s10 = int_to_ptr.vmem [resolvable:$true] %s51_s10 }
  0x25   :  { %s457_s0 = scalar_lea.vmem %s52_s10, 2048  ;;  %p462_p2 = scmp.lt.s32.totalorder %s52_s10, %s52_s10 }
  0x26   :  { %p458_p1 = scmp.ne.s32.totalorder %s52_s10, %s457_s0  ;;  %p463_p3 = scmp.lt.s32.totalorder %s457_s0, %s457_s0 }
  0x28   :  { %p464_p4 = por %p463_p3, %p462_p2 }
  0x2a   :  { %p465_p5 = pnand %p464_p4, %p458_p1 }
  0x2c   :  { %468 = shalt.err (!%p465_p5)
}
  0x2d   :  { %57 = dma.hbm_to_vmem [thread:$0]  %s591_s3, 2048, %s52_s10, [#allocation9], %s500_s1, %s500_s1, %s501_s6  }
  0x2e   :  { %489 = dma.done.wait [#allocation3], 128  }
  0x2f   :  { %490 = vsyncadd [#allocation3], 4294967168 }
  0x30   :  { %491 = dma.done.wait [#allocation6], 2176  }
  0x31   :  { %492 = vsyncadd [#allocation6], 4294965120 }
  0x32   :  { %493 = dma.done.wait [#allocation9], 2048  }
  0x33   :  { %494 = vsyncadd [#allocation9], 4294965248  ;;  %v503_v0 = vmov 0.0   ;;  %vm504_vm0 = vmmov 0   ;;  %v105_v1 = vld [vmem:[#allocation8 + $0x78] sm:$0xff]  ;;  %v104_v3 = vld [vmem:[#allocation8 + $0x70] sm:$0xff] }
  0x34   :  { %308 = vmatprep.subr.mxu0 %v503_v0  ;;  %343 = vmatprep.subr.mxu1 %v503_v0  ;;  %v89_v2 = vld [vmem:[#allocation7 + $0x78] sm:$0xff]  ;;  %v88_v4 = vld [vmem:[#allocation7 + $0x70] sm:$0xff]  ;;  %v103_v5 = vld [vmem:[#allocation8 + $0x68] sm:$0xff]  ;;  %s505_s13 = smov [#allocation10]  }
  0x35   :  { %340 = vmatprep.mubr.msk.f32.mxu0 %vm504_vm0, %v503_v0  ;;  %375 = vmatprep.mubr.msk.f32.mxu1 %vm504_vm0, %v503_v0  ;;  %v87_v6 = vld [vmem:[#allocation7 + $0x68] sm:$0xff]  ;;  %v102_v7 = vld [vmem:[#allocation8 + $0x60] sm:$0xff]  ;;  %v101_v9 = vld [vmem:[#allocation8 + $0x58] sm:$0xff]  ;;  %s262_s14 = sshll.u32 %s505_s13, 4  ;;  %s263_s14 = int_to_ptr.vmem [resolvable:$true] %s262_s14 }
  0x36   :  { %309 = vmatpush3.msra.mxu0 %v105_v1  ;;  %344 = vmatpush3.msra.mxu1 %v89_v2  ;;  %v86_v8 = vld [vmem:[#allocation7 + $0x60] sm:$0xff]  ;;  %v85_v10 = vld [vmem:[#allocation7 + $0x58] sm:$0xff]  ;;  %v100_v11 = vld [vmem:[#allocation8 + $0x50] sm:$0xff]  ;;  %s469_s15 = scalar_lea.vmem %s263_s14, 128  ;;  %p474_p7 = scmp.lt.s32.totalorder %s263_s14, %s263_s14 }
  0x37   :  { %310 = vmatprep.subr.mxu0 %v503_v0  ;;  %345 = vmatprep.subr.mxu1 %v503_v0  ;;  %v84_v12 = vld [vmem:[#allocation7 + $0x50] sm:$0xff]  ;;  %v99_v13 = vld [vmem:[#allocation8 + $0x48] sm:$0xff]  ;;  %v98_v15 = vld [vmem:[#allocation8 + $0x40] sm:$0xff]  ;;  %p470_p6 = scmp.ne.s32.totalorder %s263_s14, %s469_s15  ;;  %p475_p8 = scmp.lt.s32.totalorder %s469_s15, %s469_s15 }
  0x38   :  { %311 = vmatpush3.msra.mxu0 %v104_v3  ;;  %346 = vmatpush3.msra.mxu1 %v88_v4  ;;  %v83_v14 = vld [vmem:[#allocation7 + $0x48] sm:$0xff]  ;;  %v82_v16 = vld [vmem:[#allocation7 + $0x40] sm:$0xff]  ;;  %v97_v17 = vld [vmem:[#allocation8 + $0x38] sm:$0xff] }
  0x39   :  { %312 = vmatprep.subr.mxu0 %v503_v0  ;;  %347 = vmatprep.subr.mxu1 %v503_v0  ;;  %v81_v18 = vld [vmem:[#allocation7 + $0x38] sm:$0xff]  ;;  %v96_v19 = vld [vmem:[#allocation8 + $0x30] sm:$0xff]  ;;  %v95_v21 = vld [vmem:[#allocation8 + $0x28] sm:$0xff]  ;;  %p476_p9 = por %p475_p8, %p474_p7 }
  0x3a   :  { %313 = vmatpush3.msra.mxu0 %v103_v5  ;;  %348 = vmatpush3.msra.mxu1 %v87_v6  ;;  %v80_v20 = vld [vmem:[#allocation7 + $0x30] sm:$0xff]  ;;  %v79_v22 = vld [vmem:[#allocation7 + $0x28] sm:$0xff]  ;;  %v94_v23 = vld [vmem:[#allocation8 + $0x20] sm:$0xff] }
  0x3b   :  { %314 = vmatprep.subr.mxu0 %v503_v0  ;;  %349 = vmatprep.subr.mxu1 %v503_v0  ;;  %v78_v24 = vld [vmem:[#allocation7 + $0x20] sm:$0xff]  ;;  %v93_v25 = vld [vmem:[#allocation8 + $0x18] sm:$0xff]  ;;  %v92_v27 = vld [vmem:[#allocation8 + $0x10] sm:$0xff]  ;;  %p477_p10 = pnand %p476_p9, %p470_p6 }
  0x3c   :  { %315 = vmatpush3.msra.mxu0 %v102_v7  ;;  %350 = vmatpush3.msra.mxu1 %v86_v8  ;;  %v77_v26 = vld [vmem:[#allocation7 + $0x18] sm:$0xff]  ;;  %v76_v28 = vld [vmem:[#allocation7 + $0x10] sm:$0xff]  ;;  %v91_v29 = vld [vmem:[#allocation8 + $0x8] sm:$0xff] }
  0x3d   :  { %316 = vmatprep.subr.mxu0 %v503_v0  ;;  %351 = vmatprep.subr.mxu1 %v503_v0  ;;  %v75_v30 = vld [vmem:[#allocation7 + $0x8] sm:$0xff]  ;;  %v90_v31 = vld [vmem:[#allocation8] sm:$0xff]  ;;  %v73_v33 = vld [vmem:[#allocation5] sm:$0xff] }
  0x3e   :  { %317 = vmatpush3.msra.mxu0 %v101_v9  ;;  %352 = vmatpush3.msra.mxu1 %v85_v10  ;;  %v74_v32 = vld [vmem:[#allocation7] sm:$0xff]  ;;  %v72_v34 = vld [vmem:[#allocation2] sm:$0xff] }
  0x3f   :  { %318 = vmatprep.subr.mxu0 %v503_v0  ;;  %353 = vmatprep.subr.mxu1 %v503_v0  ;;  %v273_v37 = vld [vmem:[%s592_s4] ss:$0 sm:$0xff] }
  0x40   :  { %319 = vmatpush3.msra.mxu0 %v100_v11  ;;  %354 = vmatpush3.msra.mxu1 %v84_v12 }
  0x41   :  { %320 = vmatprep.subr.mxu0 %v503_v0  ;;  %355 = vmatprep.subr.mxu1 %v503_v0 }
  0x42   :  { %321 = vmatpush3.msra.mxu0 %v99_v13  ;;  %356 = vmatpush3.msra.mxu1 %v83_v14 }
  0x43   :  { %322 = vmatprep.subr.mxu0 %v503_v0  ;;  %357 = vmatprep.subr.mxu1 %v503_v0 }
  0x44   :  { %323 = vmatpush3.msra.mxu0 %v98_v15  ;;  %358 = vmatpush3.msra.mxu1 %v82_v16 }
  0x45   :  { %324 = vmatprep.subr.mxu0 %v503_v0  ;;  %359 = vmatprep.subr.mxu1 %v503_v0 }
  0x46   :  { %325 = vmatpush3.msra.mxu0 %v97_v17  ;;  %360 = vmatpush3.msra.mxu1 %v81_v18 }
  0x47   :  { %326 = vmatprep.subr.mxu0 %v503_v0  ;;  %361 = vmatprep.subr.mxu1 %v503_v0 }
  0x48   :  { %327 = vmatpush3.msra.mxu0 %v96_v19  ;;  %362 = vmatpush3.msra.mxu1 %v80_v20 }
  0x49   :  { %328 = vmatprep.subr.mxu0 %v503_v0  ;;  %363 = vmatprep.subr.mxu1 %v503_v0 }
  0x4a   :  { %329 = vmatpush3.msra.mxu0 %v95_v21  ;;  %364 = vmatpush3.msra.mxu1 %v79_v22 }
  0x4b   :  { %330 = vmatprep.subr.mxu0 %v503_v0  ;;  %365 = vmatprep.subr.mxu1 %v503_v0 }
  0x4c   :  { %331 = vmatpush3.msra.mxu0 %v94_v23  ;;  %366 = vmatpush3.msra.mxu1 %v78_v24 }
  0x4d   :  { %332 = vmatprep.subr.mxu0 %v503_v0  ;;  %367 = vmatprep.subr.mxu1 %v503_v0 }
  0x4e   :  { %333 = vmatpush3.msra.mxu0 %v93_v25  ;;  %368 = vmatpush3.msra.mxu1 %v77_v26 }
  0x4f   :  { %334 = vmatprep.subr.mxu0 %v503_v0  ;;  %369 = vmatprep.subr.mxu1 %v503_v0 }
  0x50   :  { %335 = vmatpush3.msra.mxu0 %v92_v27  ;;  %370 = vmatpush3.msra.mxu1 %v76_v28 }
  0x51   :  { %336 = vmatprep.subr.mxu0 %v503_v0  ;;  %371 = vmatprep.subr.mxu1 %v503_v0 }
  0x52   :  { %337 = vmatpush3.msra.mxu0 %v91_v29  ;;  %372 = vmatpush3.msra.mxu1 %v75_v30 }
  0x53   :  { %338 = vmatprep.subr.mxu0 %v503_v0  ;;  %373 = vmatprep.subr.mxu1 %v503_v0 }
  0x54   :  { %339 = vmatpush3.msra.mxu0 %v90_v31  ;;  %374 = vmatpush3.msra.mxu1 %v74_v32 }
  0x55   :  { %341 = vmatmul.mubr.f32.vlgmr.msra.gmra.mxu0 %v73_v33  ;;  %376 = vmatmul.mubr.f32.vlgmr.msra.gmra.mxu1 %v72_v34 }
 0x115   :  { %v172_v35 = vpop.f32.mrf.mxu0  ;;  %v242_v36 = vpop.f32.mrf.mxu1 }
 0x116   :  { %v243_v38 = vadd.f32 %v242_v36, %v172_v35 }
 0x117   :  { %v342_v39 = vpop.f32.mrf.mxu0  ;;  %v377_v40 = vpop.f32.mrf.mxu1 }
 0x118   :  { %v253_v41 = vadd.f32 %v273_v37, %v243_v38 }
 0x11a   :  { %387 = vtanh.f32 %v253_v41 }
 0x127   :  { %v388_v42 = vpop.eup %387 }
 0x128   :  { %255 = vst [vmem:[#allocation10] sm:$0xff] %v388_v42 }
 0x129   :  { %480 = shalt.err (!%p477_p10)
}
 0x12a   :  { %265 = dma.vmem_to_hbm [thread:$0]  %s263_s14, 128, %s593_s5, [#allocation4]  }
 0x12b   :  { %495 = dma.done.wait [#allocation4], 128  }
 0x12c   :  { %496 = vsyncadd [#allocation4], 4294967168 }
 0x12d   :  { %269 = vsyncpa [#allocation3], 1 }
 0x12e   :  { %270 = vsyncpa [#allocation6], 1 }
 0x12f   :  { %271 = vsyncpa [#allocation9], 1 }
 0x130   :  { %272 = vsyncpa [#allocation4], 1 }

</bundles_post_ra>
